<compile_context>
chip_gen: v7x
topology: tpu7x:2x2x1
jax: 0.10.0
libtpu: 0.0.40
codegen_flags: <defaults>
</compile_context>

<pallas_src>
import functools
import math
import random

import numpy as np

import jax
import jax.numpy as jnp
from jax.experimental import pallas as pl
from jax.experimental.pallas import tpu as pltpu


_VMEM_LIMIT_BYTES = 48 * 1024 * 1024   # safe on v7x (64 MiB physical), ample on v5e/v6e
_BLOCK_BUDGET_BYTES = 6 * 1024 * 1024  # per-block budget, counted in f32 bytes (see below)


def _cdiv(a: int, b: int) -> int:
    return -(-a // b)


# ----------------------------------------------------------------------------
# Gaussian weights + reflect-padded banded convolution matrices (host-side).
# ----------------------------------------------------------------------------

def _gaussian_kernel1d(kernel_size: int, sigma: float):
    """Matches torchvision._get_gaussian_kernel1d (returns python floats)."""
    half = (kernel_size - 1) * 0.5
    xs = [(-half + i) for i in range(kernel_size)]
    pdf = [math.exp(-0.5 * (x / sigma) ** 2) for x in xs]
    s = sum(pdf)
    return [p / s for p in pdf]


def _reflect_index(m: int, n: int) -> int:
    """torch 'reflect' padding (edge pixel not repeated)."""
    if m < 0:
        return -m
    if m > n - 1:
        return 2 * (n - 1) - m
    return m


def _banded_reflect_matrix(n: int, w1d) -> np.ndarray:
    """(n, n) matrix M with M[y, r] = sum of gaussian taps landing on source index r
    for output index y, with reflect boundary handling folded in."""
    k = len(w1d)
    pad = k // 2
    assert pad < n, "reflect padding requires kernel_size // 2 < spatial size"
    M = np.zeros((n, n), dtype=np.float32)
    for y in range(n):
        for i in range(k):
            M[y, _reflect_index(y + i - pad, n)] += w1d[i]
    return M


def _choose_plane_block(num_planes: int, H: int, W: int,
                        block_budget_bytes: int = _BLOCK_BUDGET_BYTES) -> int:
    """Planes per grid step (TB).

    The budget is counted in f32 bytes per element regardless of input dtype: the
    kernel materializes f32 intermediates of block size, so f32 sizing is the right
    conservative measure (review correctness note 3).  Total VMEM working set is
    roughly 4*block (in+out, double-buffered) + ~3*block temporaries + tiny
    constants, which for a 6 MiB block stays under ~44 MiB — inside v7x's 64 MiB
    VMEM and far inside v5e/v6e's 128 MiB.
    """
    w_lanes = _cdiv(W, 128) * 128           # VMEM lane padding
    h_sub = _cdiv(H, 8) * 8                 # VMEM sublane padding
    plane_bytes = h_sub * w_lanes * 4
    tb_budget = max(1, block_budget_bytes // plane_bytes)
    tb_two_steps = _cdiv(num_planes, 2)     # keep >= 2 grid steps for v7x's 2 TensorCores
    tb = max(1, min(tb_budget, tb_two_steps, num_planes))

    # Prefer an even number of grid steps (balanced megacore sharding) when that
    # does not shrink the block below half of the budget.
    steps = _cdiv(num_planes, tb)
    if steps > 1 and steps % 2 == 1:
        tb_alt = _cdiv(num_planes, steps + 1)
        if _cdiv(num_planes, tb_alt) % 2 == 0 and tb_alt >= max(1, tb // 2):
            tb = tb_alt
    return tb


# ----------------------------------------------------------------------------
# Pallas kernel builder (cached per kernel_size / shape / dtype).
# ----------------------------------------------------------------------------

@functools.lru_cache(maxsize=None)
def _build_blur_fn(kernel_size: int, num_planes: int, H: int, W: int, dtype_str: str):
    sigma = 0.3 * ((kernel_size - 1) * 0.5 - 1) + 0.8
    w1d = _gaussian_kernel1d(kernel_size, sigma)

    compute_dtype = jnp.bfloat16            # single-pass MXU, f32 accumulation
    A_np = _banded_reflect_matrix(H, w1d)   # vertical pass:   t = A @ x
    Bt_np = _banded_reflect_matrix(W, w1d).T  # horizontal pass: o = x @ B^T
    out_dtype = jnp.dtype(dtype_str)

    TB = _choose_plane_block(num_planes, H, W)
    grid = (_cdiv(num_planes, TB),)         # ragged last block handled by Pallas padding

    # torchvision rounds + clamps for integer images; floats just cast.
    if jnp.issubdtype(out_dtype, jnp.integer):
        info = jnp.iinfo(out_dtype)

        def _finalize(v):
            return jnp.clip(jnp.round(v), info.min, info.max).astype(out_dtype)
    else:
        def _finalize(v):
            return v.astype(out_dtype)

    def _unrolled_or_rolled(body_fn):
        """Run body_fn(b) for b in [0, TB): unrolled when small (LLO visibility),
        rolled fori_loop otherwise (keeps code size/compile time bounded)."""
        if TB <= 8:
            for b in range(TB):
                body_fn(b)
        else:
            def loop_body(b, carry):
                body_fn(b)
                return carry
            jax.lax.fori_loop(0, TB, loop_body, 0)

    # (TB, H, W) -> (TB*H, W) is layout-preserving only when H % 8 == 0 (sublane tile).
    batched_h = (H % 8 == 0)

    if batched_h:
        def blur_kernel(a_ref, bt_ref, x_ref, o_ref, t_ref):
            a = a_ref[...]                                   # (H, H) bf16, resident
            bt = bt_ref[...]                                 # (W, W) bf16, resident
            # ---- horizontal pass: ONE tall MXU matmul over all TB planes ----
            x = x_ref[...].astype(compute_dtype)             # (TB, H, W)
            t = jnp.dot(x.reshape(TB * H, W), bt,
                        preferred_element_type=jnp.float32)  # (TB*H, W) f32
            t_ref[...] = t.reshape(TB, H, W).astype(compute_dtype)

            # ---- vertical pass: per-plane A @ t_b (can't batch without a transpose) ----
            def one_plane(b):
                ob = jnp.dot(a, t_ref[b], preferred_element_type=jnp.float32)
                o_ref[b] = _finalize(ob)

            _unrolled_or_rolled(one_plane)

        scratch_shapes = [pltpu.VMEM((TB, H, W), compute_dtype)]
    else:
        # Fallback when H % 8 != 0: per-plane for both passes (avoids relayout copies).
        def blur_kernel(a_ref, bt_ref, x_ref, o_ref):
            a = a_ref[...]
            bt = bt_ref[...]

            def one_plane(b):
                xb = x_ref[b].astype(compute_dtype)                          # (H, W)
                tb_plane = jnp.dot(a, xb, preferred_element_type=jnp.float32)
                ob = jnp.dot(tb_plane.astype(compute_dtype), bt,
                             preferred_element_type=jnp.float32)
                o_ref[b] = _finalize(ob)

            _unrolled_or_rolled(one_plane)

        scratch_shapes = []

    call = pl.pallas_call(
        blur_kernel,
        out_shape=jax.ShapeDtypeStruct((num_planes, H, W), out_dtype),
        grid_spec=pltpu.PrefetchScalarGridSpec(
            num_scalar_prefetch=0,
            grid=grid,
            in_specs=[
                pl.BlockSpec((H, H), lambda i: (0, 0)),         # A    (resident)
                pl.BlockSpec((W, W), lambda i: (0, 0)),         # B^T  (resident)
                pl.BlockSpec((TB, H, W), lambda i: (i, 0, 0)),
            ],
            out_specs=pl.BlockSpec((TB, H, W), lambda i: (i, 0, 0)),
            scratch_shapes=scratch_shapes,
        ),
        compiler_params=pltpu.CompilerParams(
            dimension_semantics=("parallel",),
            vmem_limit_bytes=_VMEM_LIMIT_BYTES,
        ),
    )

    a_const = jnp.asarray(A_np, dtype=compute_dtype)
    bt_const = jnp.asarray(Bt_np, dtype=compute_dtype)

    @jax.jit
    def blur(img):
        x = img.reshape(num_planes, H, W)        # free reshape: no HBM traffic
        out = call(a_const, bt_const, x)
        return out.reshape(img.shape)

    return blur


def gaussian_blur_pallas(img: jax.Array, kernel_size: int) -> jax.Array:
    """img: (N, C, H, W) -> blurred (N, C, H, W)."""
    N, C, H, W = img.shape
    return _build_blur_fn(int(kernel_size), N * C, H, W, str(img.dtype))(img)


# ----------------------------------------------------------------------------
# Module wrapper (same forward semantics as the PyTorch layer).
# ----------------------------------------------------------------------------

class GaussianBlur:
    """JAX/Pallas port of noise_layers.gaussian_blur.GaussianBlur."""

    def __init__(self, kernel_sizes):
        assert all(k % 2 == 1 for k in kernel_sizes), "All kernel sizes must be odd"
        self.kernel_sizes = list(kernel_sizes)

    def __call__(self, noised_and_cover):
        noised_image = noised_and_cover[0]
        kernel_size = random.choice(self.kernel_sizes)   # host-side, as in the original
        noised_and_cover[0] = gaussian_blur_pallas(noised_image, kernel_size)
        return noised_and_cover

    def __repr__(self):
        return f"GaussianBlur(kernel_sizes={self.kernel_sizes})"


# ----------------------------------------------------------------------------
# Pure-JAX f32 reference (reflect pad + separable depthwise conv) for sanity check.
# ----------------------------------------------------------------------------

def _reference_blur(img, kernel_size):
    sigma = 0.3 * ((kernel_size - 1) * 0.5 - 1) + 0.8
    w1d = jnp.asarray(_gaussian_kernel1d(kernel_size, sigma), dtype=jnp.float32)
    pad = kernel_size // 2
    N, C, H, W = img.shape
    x = jnp.pad(img, ((0, 0), (0, 0), (pad, pad), (pad, pad)), mode="reflect")
    tmp = sum(w1d[i] * x[:, :, :, i:i + W] for i in range(kernel_size))    # horizontal
    out = sum(w1d[i] * tmp[:, :, i:i + H, :] for i in range(kernel_size))  # vertical
    return out


if __name__ == "__main__":
    random.seed(0)  # deterministic kernel-size choice

    key = jax.random.PRNGKey(0)
    N, C, H, W = 2, 4, 16, 16
    noised = jax.random.normal(key, (N, C, H, W), dtype=jnp.float32)
    cover = jax.random.normal(jax.random.fold_in(key, 1), (N, C, H, W), dtype=jnp.float32)

    layer = GaussianBlur(kernel_sizes=[3, 5])
    noised_and_cover = [noised, cover]
    result = layer(noised_and_cover)
    blurred = jax.block_until_ready(result[0])

    # Sanity check vs pure-JAX f32 reference for the same kernel size the layer picked.
    random.seed(0)
    k = random.choice(layer.kernel_sizes)
    ref = _reference_blur(noised, k)
    assert blurred.shape == (N, C, H, W)
    max_err = float(jnp.max(jnp.abs(blurred - ref)))
    # Single-pass bf16 MXU matmuls (DEFAULT precision, per review) leave ~1e-3..1e-2
    # abs error on N(0,1) inputs vs an f32 reference; tolerance loosened accordingly.
    assert jnp.allclose(blurred, ref, atol=2e-2, rtol=2e-2), f"max_err={max_err}"

    print("KERNEL_OK")
</pallas_src>

<mosaic_0001>
module attributes {stable_mosaic.version = 11 : i64} {
  func.func @blur_kernel(%arg0: i32, %arg1: memref<16x16xbf16, #tpu.memory_space<vmem>>, %arg2: memref<16x16xbf16, #tpu.memory_space<vmem>>, %arg3: memref<4x16x16xf32, #tpu.memory_space<vmem>>, %arg4: memref<4x16x16xf32, #tpu.memory_space<vmem>>, %arg5: memref<4x16x16xbf16, #tpu.memory_space<vmem>>) attributes {dimension_semantics = [#tpu.dimension_semantics<parallel>], iteration_bounds = array<i64: 2>, scalar_prefetch = 0 : i64, scratch_operands = 1 : i64, tpu.core_type = #tpu.core_type<tc>, window_params = [{pipeline_mode = #tpu.pipeline_mode<synchronous>, transform_indices = @transform_0, window_bounds = array<i64: 16, 16>}, {pipeline_mode = #tpu.pipeline_mode<synchronous>, transform_indices = @transform_1, window_bounds = array<i64: 16, 16>}, {transform_indices = @transform_2, window_bounds = array<i64: 4, 16, 16>}, {transform_indices = @transform_3, window_bounds = array<i64: 4, 16, 16>}]} {
    %c0 = arith.constant 0 : index
    %c0_0 = arith.constant 0 : index
    %0 = vector.load %arg1[%c0, %c0_0] : memref<16x16xbf16, #tpu.memory_space<vmem>>, vector<16x16xbf16>
    %c0_1 = arith.constant 0 : index
    %c0_2 = arith.constant 0 : index
    %1 = vector.load %arg2[%c0_1, %c0_2] : memref<16x16xbf16, #tpu.memory_space<vmem>>, vector<16x16xbf16>
    %c0_3 = arith.constant 0 : index
    %c0_4 = arith.constant 0 : index
    %c0_5 = arith.constant 0 : index
    %2 = vector.load %arg3[%c0_3, %c0_4, %c0_5] : memref<4x16x16xf32, #tpu.memory_space<vmem>>, vector<4x16x16xf32>
    %3 = arith.truncf %2 : vector<4x16x16xf32> to vector<4x16x16xbf16>
    %4 = vector.shape_cast %3 : vector<4x16x16xbf16> to vector<64x16xbf16>
    %cst = arith.constant dense<0.000000e+00> : vector<64x16xf32>
    %5 = tpu.matmul %4, %1, %cst {dimension_numbers = #tpu.dot_dimension_numbers<[1], [0], [0], [1], [0, 0, 1, 1], [], []>} : vector<64x16xbf16>, vector<16x16xbf16>, vector<64x16xf32> -> vector<64x16xf32>
    %6 = vector.shape_cast %5 : vector<64x16xf32> to vector<4x16x16xf32>
    %7 = arith.truncf %6 : vector<4x16x16xf32> to vector<4x16x16xbf16>
    %c0_6 = arith.constant 0 : index
    %c0_7 = arith.constant 0 : index
    %c0_8 = arith.constant 0 : index
    %8 = vector.load %arg5[%c0_6, %c0_7, %c0_8] : memref<4x16x16xbf16, #tpu.memory_space<vmem>>, vector<4x16x16xbf16>
    tpu.vector_store %arg5[%c0_6, %c0_7, %c0_8], %7 {strides = array<i32>} : memref<4x16x16xbf16, #tpu.memory_space<vmem>>, vector<4x16x16xbf16>,
    %c0_9 = arith.constant 0 : index
    %c0_10 = arith.constant 0 : index
    %c0_11 = arith.constant 0 : index
    %9 = vector.load %arg5[%c0_9, %c0_10, %c0_11] : memref<4x16x16xbf16, #tpu.memory_space<vmem>>, vector<1x16x16xbf16>
    %10 = vector.shape_cast %9 : vector<1x16x16xbf16> to vector<16x16xbf16>
    %cst_12 = arith.constant dense<0.000000e+00> : vector<16x16xf32>
    %11 = tpu.matmul %0, %10, %cst_12 {dimension_numbers = #tpu.dot_dimension_numbers<[1], [0], [0], [1], [0, 0, 1, 1], [], []>} : vector<16x16xbf16>, vector<16x16xbf16>, vector<16x16xf32> -> vector<16x16xf32>
    %c0_13 = arith.constant 0 : index
    %c0_14 = arith.constant 0 : index
    %c0_15 = arith.constant 0 : index
    %12 = vector.load %arg4[%c0_13, %c0_14, %c0_15] : memref<4x16x16xf32, #tpu.memory_space<vmem>>, vector<1x16x16xf32>
    %13 = vector.shape_cast %12 : vector<1x16x16xf32> to vector<16x16xf32>
    %14 = vector.shape_cast %11 : vector<16x16xf32> to vector<1x16x16xf32>
    tpu.vector_store %arg4[%c0_13, %c0_14, %c0_15], %14 {strides = array<i32>} : memref<4x16x16xf32, #tpu.memory_space<vmem>>, vector<1x16x16xf32>,
    %c1 = arith.constant 1 : index
    %c0_16 = arith.constant 0 : index
    %c0_17 = arith.constant 0 : index
    %15 = vector.load %arg5[%c1, %c0_16, %c0_17] : memref<4x16x16xbf16, #tpu.memory_space<vmem>>, vector<1x16x16xbf16>
    %16 = vector.shape_cast %15 : vector<1x16x16xbf16> to vector<16x16xbf16>
    %cst_18 = arith.constant dense<0.000000e+00> : vector<16x16xf32>
    %17 = tpu.matmul %0, %16, %cst_18 {dimension_numbers = #tpu.dot_dimension_numbers<[1], [0], [0], [1], [0, 0, 1, 1], [], []>} : vector<16x16xbf16>, vector<16x16xbf16>, vector<16x16xf32> -> vector<16x16xf32>
    %c1_19 = arith.constant 1 : index
    %c0_20 = arith.constant 0 : index
    %c0_21 = arith.constant 0 : index
    %18 = vector.load %arg4[%c1_19, %c0_20, %c0_21] : memref<4x16x16xf32, #tpu.memory_space<vmem>>, vector<1x16x16xf32>
    %19 = vector.shape_cast %18 : vector<1x16x16xf32> to vector<16x16xf32>
    %20 = vector.shape_cast %17 : vector<16x16xf32> to vector<1x16x16xf32>
    tpu.vector_store %arg4[%c1_19, %c0_20, %c0_21], %20 {strides = array<i32>} : memref<4x16x16xf32, #tpu.memory_space<vmem>>, vector<1x16x16xf32>,
    %c2 = arith.constant 2 : index
    %c0_22 = arith.constant 0 : index
    %c0_23 = arith.constant 0 : index
    %21 = vector.load %arg5[%c2, %c0_22, %c0_23] : memref<4x16x16xbf16, #tpu.memory_space<vmem>>, vector<1x16x16xbf16>
    %22 = vector.shape_cast %21 : vector<1x16x16xbf16> to vector<16x16xbf16>
    %cst_24 = arith.constant dense<0.000000e+00> : vector<16x16xf32>
    %23 = tpu.matmul %0, %22, %cst_24 {dimension_numbers = #tpu.dot_dimension_numbers<[1], [0], [0], [1], [0, 0, 1, 1], [], []>} : vector<16x16xbf16>, vector<16x16xbf16>, vector<16x16xf32> -> vector<16x16xf32>
    %c2_25 = arith.constant 2 : index
    %c0_26 = arith.constant 0 : index
    %c0_27 = arith.constant 0 : index
    %24 = vector.load %arg4[%c2_25, %c0_26, %c0_27] : memref<4x16x16xf32, #tpu.memory_space<vmem>>, vector<1x16x16xf32>
    %25 = vector.shape_cast %24 : vector<1x16x16xf32> to vector<16x16xf32>
    %26 = vector.shape_cast %23 : vector<16x16xf32> to vector<1x16x16xf32>
    tpu.vector_store %arg4[%c2_25, %c0_26, %c0_27], %26 {strides = array<i32>} : memref<4x16x16xf32, #tpu.memory_space<vmem>>, vector<1x16x16xf32>,
    %c3 = arith.constant 3 : index
    %c0_28 = arith.constant 0 : index
    %c0_29 = arith.constant 0 : index
    %27 = vector.load %arg5[%c3, %c0_28, %c0_29] : memref<4x16x16xbf16, #tpu.memory_space<vmem>>, vector<1x16x16xbf16>
    %28 = vector.shape_cast %27 : vector<1x16x16xbf16> to vector<16x16xbf16>
    %cst_30 = arith.constant dense<0.000000e+00> : vector<16x16xf32>
    %29 = tpu.matmul %0, %28, %cst_30 {dimension_numbers = #tpu.dot_dimension_numbers<[1], [0], [0], [1], [0, 0, 1, 1], [], []>} : vector<16x16xbf16>, vector<16x16xbf16>, vector<16x16xf32> -> vector<16x16xf32>
    %c3_31 = arith.constant 3 : index
    %c0_32 = arith.constant 0 : index
    %c0_33 = arith.constant 0 : index
    %30 = vector.load %arg4[%c3_31, %c0_32, %c0_33] : memref<4x16x16xf32, #tpu.memory_space<vmem>>, vector<1x16x16xf32>
    %31 = vector.shape_cast %30 : vector<1x16x16xf32> to vector<16x16xf32>
    %32 = vector.shape_cast %29 : vector<16x16xf32> to vector<1x16x16xf32>
    tpu.vector_store %arg4[%c3_31, %c0_32, %c0_33], %32 {strides = array<i32>} : memref<4x16x16xf32, #tpu.memory_space<vmem>>, vector<1x16x16xf32>,
    return
  }
  func.func @transform_0(%arg0: i32) -> (i32, i32) {
    %c0_i32 = arith.constant 0 : i32
    %c0_i32_0 = arith.constant 0 : i32
    %c0_i32_1 = arith.constant 0 : i32
    return %c0_i32, %c0_i32_0 : i32, i32
  }
  func.func @transform_1(%arg0: i32) -> (i32, i32) {
    %c0_i32 = arith.constant 0 : i32
    %c0_i32_0 = arith.constant 0 : i32
    %c0_i32_1 = arith.constant 0 : i32
    return %c0_i32, %c0_i32_0 : i32, i32
  }
  func.func @transform_2(%arg0: i32) -> (i32, i32, i32) {
    %c0_i32 = arith.constant 0 : i32
    %c0_i32_0 = arith.constant 0 : i32
    %c0_i32_1 = arith.constant 0 : i32
    return %arg0, %c0_i32, %c0_i32_0 : i32, i32, i32
  }
  func.func @transform_3(%arg0: i32) -> (i32, i32, i32) {
    %c0_i32 = arith.constant 0 : i32
    %c0_i32_0 = arith.constant 0 : i32
    %c0_i32_1 = arith.constant 0 : i32
    return %arg0, %c0_i32, %c0_i32_0 : i32, i32, i32
  }
}

</mosaic_0001>

<bundles_post_ra>
// kernel: blur.1
= control target key start
LH: loop header
LB: loop body
LE: loop exit
PB: predicated region body
PF: predicated region fallthrough
CT: control target
= control target key end

     0   :  { %8 = vsyncpa [#allocation4], 0  ;;  %s1151_s0 = inlined_call_operand.hbm [shape: bf16[16,16], index: 0, kind: input, shape index: {}]   ;;  %s1152_s1 = inlined_call_operand.vmem [shape: bf16[16,16], index: 1, kind: input, shape index: {}]   ;;  %s1153_s2 = inlined_call_operand.hbm [shape: f32[8,16,16], index: 2, kind: input, shape index: {}]   ;;  %s1154_s3 = inlined_call_operand.hbm [shape: f32[8,16,16], index: 3, kind: output, shape index: {}]  }
   0x1   :  { %9 = vsyncpa [#allocation7], 0 }
   0x2   :  { %11 = vsyncpa [#allocation7 + $0x1], 0 }
   0x3   :  { %12 = vsyncpa [#allocation5], 0 }
   0x4   :  { %14 = vsyncpa [#allocation5 + $0x1], 0  ;;  %s919_s12 = smov 0   ;;  %s921_s13 = smov 0  }
   0x5   :  { %s923_s14 = smov 0   ;;  %s925_s15 = smov 0  }
   0x6 LB: > { %s940_s16 = sadd.s32 4294967295, %s886_s15   ;;  %s606_s17 = sadd.s32 4294967294, %s886_s15   ;;  %s886_s15 = sphi %s925_s15, %s1174_s15   ;;  %s882_s14 = sphi %s923_s14, %s1173_s14   ;;  %s878_s13 = sphi %s921_s13, %s1172_s13   ;;  %s874_s12 = sphi %s919_s12, %s1171_s12  }
   0x7   : > { %p82_p0 = scmp.ne.s32.totalorder %s878_s13, %s874_s12  ;;  %p1155_p1 = scmp.eq.s32.totalorder %s940_s16, 0 }
   0x8   : > { %p112_p3 = scmp.eq.s32.totalorder %s606_s17, 1  ;;  %p607_p5 = scmp.ge.s32.totalorder %s886_s15, 1 }
   0x9   : > { %p949_p4 = por %p1155_p1, %p82_p0  ;;  %p119_p7 = scmp.lt.s32.totalorder %s886_s15, 3 }
   0xa   : > { %p954_p6 = por %p112_p3, %p82_p0  ;;  %s888_s21 = smov [#allocation3]  }
   0xb   : > { %s1158_s18 = scalar_select %p949_p4, 1, 0 }
   0xc   : > { %s1159_s19 = scalar_select %p954_p6, 1, 0 }
   0xd   : > { %p959_p8 = pnand %p607_p5, %p119_p7  ;;  %s131_s22 = sshll.u32 %s888_s21, 4  ;;  %s963_s22 = int_to_ptr.vmem [resolvable:$true] %s131_s22 }
   0xe   : > { %s975_s24 = sadd.s32 1, %s886_s15   ;;  %s69_s25 = sadd.s32 1, %s882_s14 }
   0xf   : > { %s1160_s20 = scalar_select %p959_p8, 1, 0 }
  0x10   : > { %p699_p9 = pneg %p959_p8  ;;  %s66_s26 = ssub.s32 %s886_s15, %s975_s24 }
  0x11   : > { %s758_s29 = scalar_lea.hbm %s1151_s0, 128 }
  0x12   : > { %p970_p11 = pnand %p699_p9, %p1155_p1  ;;  %p759_p12 = scmp.ne.s32.totalorder %s1151_s0, %s758_s29 }
  0x13   : > { %p765_p5 = scmp.lt.u32.totalorder %s758_s29, %s1151_s0 }
  0x14   : > { %p760_p13 = pneg %p970_p11 }
  0x16   : > { %p761_p0 = pnand %p760_p13, %p759_p12 }
  0x18   : > { %p762_p3 = pneg %p761_p0 }
  0x1a   : > { %p767_p7 = pnand %p765_p5, %p762_p3 }
  0x1c   : > { %770 = shalt.err (!%p767_p7)
}
  0x1d   : > { %s771_s7 = scalar_lea.vmem %s963_s22, 128  ;;  %p779_p2 = scmp.lt.s32.totalorder %s963_s22, %s963_s22 }
  0x1e   : > { %p772_p9 = scmp.ne.s32.totalorder %s963_s22, %s771_s7  ;;  %p780_p6 = scmp.lt.s32.totalorder %s771_s7, %s771_s7 }
  0x20   : > { %p774_p10 = pnand %p772_p9, %p760_p13  ;;  %p781_p4 = por %p780_p6, %p779_p2 }
  0x22   : > { %p775_p1 = pneg %p774_p10 }
  0x24   : > { %p782_p8 = pnand %p781_p4, %p775_p1 }
  0x26   : > { %785 = shalt.err (!%p782_p8)
}
  0x27   : > { %s889_s8 = smov 64   ;;  %s890_s9 = smov 4  }
  0x28   : > { %702 = dma.hbm_to_vmem [thread:$0]  (!%p970_p11), %s1151_s0, 128, %s963_s22, [#allocation4], %s889_s8, %s889_s8, %s890_s9  }
  0x29   : > { %p67_p2 = scmp.eq.s32.totalorder %s66_s26, 0  ;;  %p76_p1 = scmp.ne.s32.totalorder %s882_s14, %s878_s13 }
  0x2a   : > { %p77_p4 = scmp.eq.s32.totalorder %s886_s15, 0  ;;  %p712_p6 = scmp.lt.s32.totalorder %s886_s15, 2 }
  0x2b   : > { %s1006_s17 = scalar_select %p67_p2, %s882_s14, %s69_s25  }
  0x2c   : > { %p78_p8 = por %p77_p4, %p76_p1  ;;  %p1162_p10 = scmp.eq.s32.totalorder %s940_s16, 1 }
  0x2d   : > { %s148_s27 = sand.u32 1, %s882_s14   ;;  %s641_s28 = sshll.u32 %s886_s15, 10 }
  0x2e   : > { %p1010_p12 = por %p1162_p10, %p76_p1  ;;  %s610_s29 = sshll.u32 %s148_s27, 6 }
  0x2f   : > { %s1019_s4 = scalar_lea.hbm %s1153_s2, %s641_s28  ;;  %s152_s22 = scalar_lea.vmem [#allocation6], %s610_s29 }
  0x30   : > { %s160_s25 = sshll.u32 %s152_s22, 4  ;;  %p1021_p11 = pnand %p712_p6, %p78_p8  ;;  %s1025_s25 = int_to_ptr.vmem [resolvable:$true] %s160_s25 }
  0x31   : > { %s1027_s5 = scalar_lea.sflag [#allocation7], %s148_s27  ;;  %s786_s6 = scalar_lea.hbm %s1019_s4, 1024 }
  0x32   : > { %p787_p13 = scmp.ne.s32.totalorder %s1019_s4, %s786_s6  ;;  %p788_p0 = pneg %p1021_p11 }
  0x33   : > { %s791_s9 = scalar_lea.hbm %s1153_s2, 2048  ;;  %p792_p7 = scmp.lt.u32.totalorder %s1019_s4, %s1153_s2 }
  0x34   : > { %p789_p3 = pnand %p788_p0, %p787_p13  ;;  %p793_p9 = scmp.lt.u32.totalorder %s791_s9, %s786_s6 }
  0x35   : > { %p795_p1 = scmp.lt.u32.totalorder %s786_s6, %s1019_s4 }
  0x36   : > { %p790_p5 = pneg %p789_p3  ;;  %p794_p2 = por %p793_p9, %p792_p7 }
  0x38   : > { %p796_p4 = por %p795_p1, %p794_p2 }
  0x3a   : > { %p797_p6 = pnand %p796_p4, %p790_p5 }
  0x3c   : > { %800 = shalt.err (!%p797_p6)
}
  0x3d   : > { %s801_s27 = scalar_lea.vmem %s1025_s25, 1024  ;;  %s891_s28 = smov [#allocation6]  }
  0x3e   : > { %p802_p8 = scmp.ne.s32.totalorder %s1025_s25, %s801_s27  ;;  %s806_s29 = sshll.u32 %s891_s28, 4  ;;  %s807_s29 = int_to_ptr.vmem [resolvable:$false] %s806_s29 }
  0x3f   : > { %s808_s23 = scalar_lea.vmem %s807_s29, 2048  ;;  %p809_p3 = scmp.lt.s32.totalorder %s1025_s25, %s807_s29 }
  0x40   : > { %p804_p10 = pnand %p802_p8, %p788_p0  ;;  %p810_p7 = scmp.lt.s32.totalorder %s808_s23, %s801_s27 }
  0x42   : > { %p805_p13 = pneg %p804_p10  ;;  %p811_p9 = por %p810_p7, %p809_p3 }
  0x44   : > { %p812_p2 = pnand %p811_p9, %p805_p13 }
  0x46   : > { %815 = shalt.err (!%p812_p2)
}
  0x47   : > { %s892_s30 = smov 128   ;;  %s893_s22 = smov 8  }
  0x48   : > { %706 = dma.hbm_to_vmem [thread:$0]  (!%p1021_p11), %s1019_s4, 1024, %s1025_s25, %s1027_s5, %s892_s30, %s892_s30, %s893_s22  }
  0x49   : > { %p1165_p0 = scmp.ne.s32.totalorder %s1160_s20, 0 }
  0x4a   : > { %p1166_p5 = scmp.eq.s32.totalorder (!%p1165_p0), %s940_s16, 0 }
  0x4b   : > { %172 = sbr.rel (%p1165_p0) target bundleno = 565 (0x235), region = 32 }
  0x52   : > { %861 = dma.done.wait (%p1166_p5), [#allocation4], 128   ;;  %p1167_p1 = pmov %p1166_p5 }
  0x53   : > { %s1062_s6 = sand.u32 1, %s878_s13   ;;  %p1168_p11 = scmp.ne.s32.totalorder %s1158_s18, 0 }
  0x54   : > { %863 = vsyncadd (%p1167_p1), [#allocation4], 4294967168  ;;  %s616_s7 = sshll.u32 %s1062_s6, 6  ;;  %s179_s8 = scalar_lea.sflag [#allocation7], %s1062_s6 }
  0x55   : > { %s182_s4 = scalar_lea.vmem [#allocation6], %s616_s7 }
  0x56   : > { %865 = dma.done.wait (%p1168_p11), %s179_s8, 1024  }
  0x57   : > { %867 = vsyncadd (%p1168_p11), %s179_s8, 4294966272  ;;  %v756_v0 = vld [vmem:[%s1152_s1] sm:$0xff]   ;;  %v212_v1 = vld [vmem:[%s182_s4] sm:$0xff]  ;;  %vm230_vm0 = vcmask 130048   ;;  %v894_v13 = vmov 0.0   ;;  %vm895_vm1 = vmmov 0  }
  0x58   : > { %v213_v2 = vld [vmem:[%s182_s4 + $0x8] sm:$0xff]  ;;  %v214_v3 = vld [vmem:[%s182_s4 + $0x10] sm:$0xff]  ;;  %657 = vmatprep.subr.bf16.mxu0 %v756_v0  ;;  %v215_v5 = vld [vmem:[%s182_s4 + $0x18] sm:$0xff]  ;;  %667 = vmatprep.subr.bf16.mxu1 %v894_v13  ;;  %s204_s18 = scalar_lea.vmem [#allocation8], %s616_s7  ;;  %s643_s5 = sshll.u32 %s940_s16, 10 }
  0x59   : > { %v220_v4 = vpack.c.bf16 %v213_v2, %v212_v1  ;;  %v216_v6 = vld [vmem:[%s182_s4 + $0x20] sm:$0xff]  ;;  %v217_v7 = vld [vmem:[%s182_s4 + $0x28] sm:$0xff]  ;;  %658 = vmatpush3.bf16.msra.mxu0 %v756_v0  ;;  %v221_v8 = vpack.c.bf16 %v215_v5, %v214_v3  ;;  %v218_v10 = vld [vmem:[%s182_s4 + $0x30] sm:$0xff]  ;;  %669 = vmatprep.mubr.msk.bf16.mxu1 %vm895_vm1, %v894_v13  ;;  %s521_s26 = sshll.u32 %s204_s18, 4  ;;  %s1105_s11 = scalar_lea.hbm %s1154_s3, %s643_s5  ;;  %s1100_s26 = int_to_ptr.vmem [resolvable:$true] %s521_s26 }
  0x5a   : > { %v222_v9 = vpack.c.bf16 %v217_v7, %v216_v6  ;;  %v219_v11 = vld [vmem:[%s182_s4 + $0x38] sm:$0xff]  ;;  %679 = vmatprep.subr.bf16.mxu0 %v894_v13  ;;  %s507_s27 = scalar_lea.sflag [#allocation5], %s1062_s6  ;;  %s816_s16 = scalar_lea.vmem %s1100_s26, 1024 }
  0x5b   : > { %659 = vmatprep.mubr.msk.bf16.mxu0 %vm230_vm0, %v220_v4  ;;  %v223_v12 = vpack.c.bf16 %v219_v11, %v218_v10  ;;  %v757_v27 = vld [vmem:[#allocation3] sm:$0xff]   ;;  %p817_p4 = scmp.ne.s32.totalorder %s1100_s26, %s816_s16  ;;  %s896_s28 = smov [#allocation8]  }
  0x5c   : > { %660 = vmatmul.mubr.msk.bf16.vlgmr.msra.gmra.mrb[0].mxu0 %vm230_vm0, %v221_v8  ;;  %s820_s29 = sshll.u32 %s896_s28, 4  ;;  %s821_s29 = int_to_ptr.vmem [resolvable:$false] %s820_s29 }
  0x5d   : > { %663 = vmatprep.mubr.msk.bf16.mxu0 %vm230_vm0, %v222_v9  ;;  %p818_p6 = pnand %p817_p4, %p1010_p12  ;;  %s822_s23 = scalar_lea.vmem %s821_s29, 2048 }
  0x5e   : > { %p823_p10 = scmp.lt.s32.totalorder %s1100_s26, %s821_s29  ;;  %p824_p13 = scmp.lt.s32.totalorder %s822_s23, %s816_s16 }
  0x5f   : > { %p819_p8 = pneg %p818_p6 }
  0x60   : > { %p825_p3 = por %p824_p13, %p823_p10 }
  0x62   : > { %p826_p7 = pnand %p825_p3, %p819_p8 }
  0x64   : > { %664 = vmatmul.mubr.msk.bf16.gmra.mrb[4].mxu0 %vm230_vm0, %v223_v12 }
  0x65   : > { %681 = vmatprep.mubr.msk.bf16.mxu0 %vm895_vm1, %v894_v13 }
 0x12f   : > { %v661_v14 = vpop.f32.mrb[0].mxu0 }
 0x130   : > { %v277_v15 = vpop.f32.mrb[1].mxu0 }
 0x131   : > { %v662_v16 = vpop.f32.mrb[2].mxu0 }
 0x132   : > { %v309_v17 = vpack.c.bf16 %v662_v16, %v661_v14  ;;  %v280_v18 = vpop.f32.mrb[3].mxu0 }
 0x133   : > { %v308_v19 = vpack.c.bf16 %v280_v18, %v277_v15 }
 0x134   : > { %313 = vst.msk [vmem:[#allocation2 + $0x8] sm:$0xff] %vm230_vm0, %v309_v17 }
 0x135   : > { %312 = vst.msk [vmem:[#allocation2] sm:$0xff] %vm230_vm0, %v308_v19 }
 0x137   : > { %v665_v20 = vpop.f32.mrb[4].mxu0 }
 0x138   : > { %v293_v21 = vpop.f32.mrb[5].mxu0 }
 0x139   : > { %v666_v22 = vpop.f32.mrb[6].mxu0 }
 0x13a   : > { %v311_v23 = vpack.c.bf16 %v666_v22, %v665_v20  ;;  %v296_v24 = vpop.f32.mrb[7].mxu0 }
 0x13b   : > { %v310_v25 = vpack.c.bf16 %v296_v24, %v293_v21  ;;  %v369_v28 = vld [vmem:[#allocation2 + $0x8] sm:$0xff] }
 0x13c   : > { %315 = vst.msk [vmem:[#allocation2 + $0x18] sm:$0xff] %vm230_vm0, %v311_v23  ;;  %v316_v26 = vld [vmem:[#allocation2] sm:$0xff] }
 0x13d   : > { %314 = vst.msk [vmem:[#allocation2 + $0x10] sm:$0xff] %vm230_vm0, %v310_v25  ;;  %668 = vmatpush3.bf16.msra.mxu1 %v316_v26 }
 0x13e   : > { %673 = vmatprep.subr.bf16.mxu1 %v894_v13 }
 0x140   : > { %670 = vmatmul.mubr.msk.bf16.vlgmr.msra.gmra.mrb[0].mxu1 %vm230_vm0, %v757_v27 }
 0x141   : > { %674 = vmatpush3.bf16.msra.mxu1 %v369_v28  ;;  %675 = vmatprep.mubr.msk.bf16.mxu1 %vm895_vm1, %v894_v13 }
 0x142   : > { %685 = vmatprep.subr.bf16.mxu1 %v894_v13 }
 0x143   : > { %v461_v30 = vld [vmem:[#allocation2 + $0x18] sm:$0xff] }
 0x144   : > { %v415_v29 = vld [vmem:[#allocation2 + $0x10] sm:$0xff] }
 0x145   : > { %680 = vmatpush3.bf16.msra.mxu0 %v415_v29 }
 0x148   : > { %676 = vmatmul.mubr.msk.bf16.vlgmr.msra.gmra.mrb[4].mxu1 %vm230_vm0, %v757_v27  ;;  %682 = vmatmul.mubr.msk.bf16.vlgmr.msra.gmra.mrb[8].mxu0 %vm230_vm0, %v757_v27 }
 0x149   : > { %686 = vmatpush3.bf16.msra.mxu1 %v461_v30  ;;  %687 = vmatprep.mubr.msk.bf16.mxu1 %vm895_vm1, %v894_v13 }
 0x150   : > { %688 = vmatmul.mubr.msk.bf16.vlgmr.msra.gmra.mrb[8].mxu1 %vm230_vm0, %v757_v27 }
 0x213   : > { %v359_v31 = vpop.f32.mrb[0].mxu1 }
 0x214   : > { %366 = vst.msk [vmem:[%s204_s18] sm:$0xff] %vm230_vm0, %v359_v31  ;;  %v671_v32 = vpop.f32.mrb[1].mxu1 }
 0x215   : > { %v362_v33 = vpop.f32.mrb[2].mxu1 }
 0x216   : > { %367 = vst.msk [vmem:[%s204_s18 + $0x8] sm:$0xff] %vm230_vm0, %v362_v33  ;;  %v672_v34 = vpop.f32.mrb[3].mxu1 }
 0x21b   : > { %v404_v35 = vpop.f32.mrb[4].mxu1  ;;  %v450_v36 = vpop.f32.mrb[8].mxu0 }
 0x21c   : > { %626 = vst.msk [vmem:[%s204_s18 + $0x10] sm:$0xff] %vm230_vm0, %v404_v35  ;;  %v677_v37 = vpop.f32.mrb[5].mxu1  ;;  %629 = vst.msk [vmem:[%s204_s18 + $0x20] sm:$0xff] %vm230_vm0, %v450_v36  ;;  %v683_v38 = vpop.f32.mrb[9].mxu0 }
 0x21d   : > { %v407_v39 = vpop.f32.mrb[6].mxu1  ;;  %v453_v40 = vpop.f32.mrb[10].mxu0 }
 0x21e   : > { %627 = vst.msk [vmem:[%s204_s18 + $0x18] sm:$0xff] %vm230_vm0, %v407_v39  ;;  %v678_v41 = vpop.f32.mrb[7].mxu1  ;;  %630 = vst.msk [vmem:[%s204_s18 + $0x28] sm:$0xff] %vm230_vm0, %v453_v40  ;;  %v684_v42 = vpop.f32.mrb[11].mxu0 }
 0x223   : > { %v496_v43 = vpop.f32.mrb[8].mxu1 }
 0x224   : > { %632 = vst.msk [vmem:[%s204_s18 + $0x30] sm:$0xff] %vm230_vm0, %v496_v43  ;;  %v689_v44 = vpop.f32.mrb[9].mxu1 }
 0x225   : > { %v499_v45 = vpop.f32.mrb[10].mxu1 }
 0x226   : > { %633 = vst.msk [vmem:[%s204_s18 + $0x38] sm:$0xff] %vm230_vm0, %v499_v45  ;;  %v690_v46 = vpop.f32.mrb[11].mxu1 }
 0x227   : > { %829 = shalt.err (!%p826_p7)
}
 0x228   : > { %s830_s30 = scalar_lea.hbm %s1105_s11, 1024  ;;  %s834_s8 = scalar_lea.hbm %s1154_s3, 2048 }
 0x229   : > { %p831_p9 = scmp.ne.s32.totalorder %s1105_s11, %s830_s30  ;;  %p835_p5 = scmp.lt.u32.totalorder %s1105_s11, %s1154_s3 }
 0x22a   : > { %p836_p1 = scmp.lt.u32.totalorder %s834_s8, %s830_s30  ;;  %p838_p4 = scmp.lt.u32.totalorder %s830_s30, %s1105_s11 }
 0x22b   : > { %p832_p2 = pnand %p831_p9, %p1010_p12 }
 0x22c   : > { %p837_p11 = por %p836_p1, %p835_p5 }
 0x22d   : > { %p833_p0 = pneg %p832_p2 }
 0x22e   : > { %p839_p6 = por %p838_p4, %p837_p11 }
 0x230   : > { %p840_p8 = pnand %p839_p6, %p833_p0 }
 0x232   : > { %843 = shalt.err (!%p840_p8)
}
 0x233   : > { %s897_s25 = smov 128   ;;  %s898_s18 = smov 8  }
 0x234   : > { %697 = dma.vmem_to_hbm [thread:$0]  (%p1010_p12), %s1100_s26, 1024, %s1105_s11, %s507_s27, %s897_s25, %s897_s25, %s898_s18  }
 0x235 PF: > { %s536_s5 = sand.u32 1, %s874_s12   ;;  %p1169_p10 = scmp.ne.s32.totalorder %s1159_s19, 0 }
 0x236   : > { %p1170_p13 = scmp.ge.s32.totalorder %s886_s15, 2  ;;  %s537_s9 = scalar_lea.sflag [#allocation5], %s536_s5 }
 0x238   : > { %p708_p3 = pnand %p1170_p13, %p1169_p10 }
 0x23a   : > { %869 = dma.done.wait (!%p708_p3), %s537_s9, 1024  }
 0x23b   : > { %871 = vsyncadd (!%p708_p3), %s537_s9, 4294966272  ;;  %p17_p7 = scmp.ge.s32.totalorder %s975_s24, 4   ;;  %s1171_s12 = smov %s878_s13 }
 0x23c   : > { %s1172_s13 = smov %s882_s14  ;;  %s1173_s14 = smov %s1006_s17 }
 0x23d   : > { %s1174_s15 = smov %s975_s24  ;;  %19 = sbr.rel (!%p17_p7) target bundleno = 6 (0x6), region = 88 }
 0x244   :  { %542 = vsyncpa [#allocation4], 1 }
 0x245   :  { %544 = vsyncpa [#allocation4 + $0x1], 1 }
 0x246   :  { %545 = vsyncpa [#allocation7], 1 }
 0x247   :  { %547 = vsyncpa [#allocation7 + $0x1], 1 }
 0x248   :  { %548 = vsyncpa [#allocation5], 1 }
 0x249   :  { %550 = vsyncpa [#allocation5 + $0x1], 1 }

</bundles_post_ra>
